<compile_context>
chip_gen: v5e
topology: v5e:2x2
jax: 0.10.0
libtpu: 0.0.40
codegen_flags: <defaults>
</compile_context>

<pallas_src>
import jax
import jax.numpy as jnp
from jax.experimental import pallas as pl
from jax.experimental.pallas import tpu as pltpu


# --------------------------------------------------------------------------- #
# Kernel
# --------------------------------------------------------------------------- #
def _blend_kernel(coef_ref, xs_ref, xt_ref, xm_ref, o_ref):
    """out = c_s * x_spatial + c_m * x_multiview + c_t * x_temporal.

    coef_ref:        (1, 3, L)      coefficients [c_s, c_m, c_t], native dtype
    xs/xt/xm/o refs: (1, c_blk, L)  lane-dense tiles (L = T*H*W, last dim)
    """
    c_s = coef_ref[:, 0:1, :]   # (1, 1, L) -> broadcasts over the channel block
    c_m = coef_ref[:, 1:2, :]
    c_t = coef_ref[:, 2:3, :]
    out = c_s * xs_ref[...] + c_m * xm_ref[...] + c_t * xt_ref[...]
    o_ref[...] = out.astype(o_ref.dtype)


# --------------------------------------------------------------------------- #
# Generation-aware sizing helpers
# --------------------------------------------------------------------------- #
def _tpu_sizing():
    """Returns (target_bytes_per_stream_tile, vmem_limit, input_buffers, min_grid)."""
    vmem_cap = 128 * 1024 * 1024
    try:
        vmem_cap = int(pltpu.get_tpu_info().vmem_capacity_bytes)
    except Exception:
        pass
    if vmem_cap >= 100 * 1024 * 1024:
        # v5e / v6e: 128 MiB VMEM, longer per-step time -> large tiles amortize
        # the ~0.35 us/step pipeline overhead.  4 streams x 2 bufs x 4 MiB = 32 MiB.
        return 4 * 1024 * 1024, 80 * 1024 * 1024, 2, 4
    # v7x: 64 MiB VMEM, 3.2 TB/s HBM -> shorter steps, cap tiles, keep compiler
    # headroom, and use 3-deep input buffering to hide DMA-issue latency.
    return 2 * 1024 * 1024, 44 * 1024 * 1024, 3, 8


def _pick_c_block(C, B, bytes_per_channel, target_block_bytes, min_grid_points):
    """Pick the channel-block size.

    Prefers a multiple-of-8 divisor of C near the target (no ragged tail);
    otherwise a multiple-of-8 block (Pallas masks the ragged final block).
    Enforces a floor of 8 channels so the tile never collapses to a few KiB,
    and shrinks only to give the grid enough points for megacore pipelining.
    """
    target_c = max(1, target_block_bytes // max(bytes_per_channel, 1))
    if C <= 8 or target_c >= C:
        c_blk = C
    else:
        target_c = min(target_c, C)
        best = None
        d = 8
        while d <= target_c:          # best multiple-of-8 divisor <= target
            if C % d == 0:
                best = d
            d += 8
        if best is not None:
            c_blk = best
        else:                          # no aligned divisor -> ragged tail OK
            c_blk = min(C, max(8, (target_c // 8) * 8))

    # Make sure a 2-TensorCore part gets a pipelined stream of steps per core.
    while c_blk > 8 and B * (-(-C // c_blk)) < min_grid_points:
        new_c = max(8, ((c_blk // 2) // 8) * 8)
        if new_c == c_blk:
            break
        c_blk = new_c
    return c_blk


def _data_spec(c_blk, L, buffers):
    index_map = lambda b, c: (b, c, 0)
    if buffers > 2 and hasattr(pl, "Buffered"):
        try:
            return pl.BlockSpec((1, c_blk, L), index_map,
                                pipeline_mode=pl.Buffered(buffers))
        except TypeError:
            pass
    return pl.BlockSpec((1, c_blk, L), index_map)


# --------------------------------------------------------------------------- #
# Wrapper (forward pass, merge_strategy='learned_with_images', 5-D inputs)
# --------------------------------------------------------------------------- #
def mv_temporal_blend(x_spatial, x_temporal, x_multiview, image_only_indicator,
                      spatial_mv_factor, gamma_param):
    """x_*: [B, C, T, H, W]; image_only_indicator: [B, T] with values {0,1,2}."""
    # TODO(synk): only the default 'learned_with_images' strategy / 5-D branch
    # of the PyTorch module is implemented ('fixed'/'learned' and ndims==3 are
    # trivial wrapper-side variants of the gamma/alpha computation below).
    B, C, T, H, W = x_spatial.shape
    L = T * H * W
    dtype = x_spatial.dtype
    itemsize = jnp.dtype(dtype).itemsize

    # Native contiguous layout: [B, C, T, H, W] -> [B, C, T*H*W] (no transpose).
    xs = x_spatial.reshape(B, C, L)
    xt = x_temporal.reshape(B, C, L)
    xm = x_multiview.reshape(B, C, L)

    # ---- per-(b, t) blend coefficients, hoisted into the wrapper ------------
    # gamma selection order matches the torch module: ==2 -> sigmoid(gamma),
    # then ==0 -> 1.0, then ==1 -> 0.0.  Use an int cast for robust comparison.
    ind = jnp.round(jnp.asarray(image_only_indicator)).astype(jnp.int32)     # (B, T)
    gamma_sig = jax.nn.sigmoid(jnp.asarray(gamma_param, dtype=jnp.float32))
    g = jnp.where(ind == 2, gamma_sig, jnp.float32(0.0))
    g = jnp.where(ind == 0, jnp.float32(1.0), g)
    g = jnp.where(ind == 1, jnp.float32(0.0), g)
    g = g.astype(jnp.float32).reshape(B, T)

    alpha = jax.nn.sigmoid(jnp.asarray(spatial_mv_factor, dtype=jnp.float32))
    alpha = alpha.reshape(-1)[0]                                             # scalar

    c_s = g * alpha                 # coefficient of x_spatial
    c_m = g * (1.0 - alpha)         # coefficient of x_multiview
    c_t = 1.0 - g                   # coefficient of x_temporal
    coef = jnp.stack([c_s, c_m, c_t], axis=1)                               # (B, 3, T)
    # Broadcast over H*W so the coefficient tile is lane-dense like the data,
    # then compute in the activation dtype (no f32 whole-tile temporaries).
    coef = jnp.broadcast_to(coef[..., None], (B, 3, T, H * W)).reshape(B, 3, L)
    coef = coef.astype(dtype)

    # ---- generation-aware tiling --------------------------------------------
    target_block_bytes, vmem_limit, in_buffers, min_grid = _tpu_sizing()
    bytes_per_channel = L * itemsize
    c_blk = _pick_c_block(C, B, bytes_per_channel, target_block_bytes, min_grid)
    num_c = -(-C // c_blk)
    grid = (B, num_c)

    # Block last dim = full L (lane axis); sublane dim = c_blk (mult of 8 or C).
    data_in_blk = _data_spec(c_blk, L, in_buffers)
    data_out_blk = pl.BlockSpec((1, c_blk, L), lambda b, c: (b, c, 0))
    coef_blk = pl.BlockSpec((1, 3, L), lambda b, c: (b, 0, 0))

    n_elems = B * C * L
    cost = pl.CostEstimate(
        flops=5 * n_elems,
        transcendentals=0,
        bytes_accessed=4 * n_elems * itemsize + num_c * B * 3 * L * itemsize)

    out = pl.pallas_call(
        _blend_kernel,
        out_shape=jax.ShapeDtypeStruct((B, C, L), dtype),
        grid=grid,
        in_specs=[coef_blk, data_in_blk, data_in_blk, data_in_blk],
        out_specs=data_out_blk,
        compiler_params=pltpu.CompilerParams(
            dimension_semantics=("parallel", "parallel"),
            vmem_limit_bytes=vmem_limit),
        cost_estimate=cost,
    )(coef, xs, xt, xm)

    return out.reshape(B, C, T, H, W)


# --------------------------------------------------------------------------- #
# Pure-JAX reference (mirrors the PyTorch forward)
# --------------------------------------------------------------------------- #
def reference_blend(x_spatial, x_temporal, x_multiview, image_only_indicator,
                    spatial_mv_factor, gamma_param):
    alpha = jax.nn.sigmoid(jnp.float32(spatial_mv_factor))
    x_mv = alpha * x_spatial + (1.0 - alpha) * x_multiview
    g = jnp.where(image_only_indicator == 2,
                  jax.nn.sigmoid(jnp.float32(gamma_param)), 0.0)
    g = jnp.where(image_only_indicator == 0, 1.0, g)
    g = jnp.where(image_only_indicator == 1, 0.0, g)
    g = g[:, None, :, None, None]  # ndims == 5 branch
    return g * x_mv + (1.0 - g) * x_temporal


if __name__ == "__main__":
    # Deterministic parameter init (module __init__ takes scalar init values).
    ALPHA_SPATIAL_MV = 0.5
    GAMMA = 0.5

    key = jax.random.PRNGKey(0)
    k1, k2, k3 = jax.random.split(key, 3)

    B, C, T, H, W = 2, 4, 8, 16, 16
    x_spatial = jax.random.normal(k1, (B, C, T, H, W), dtype=jnp.float32)
    x_temporal = jax.random.normal(k2, (B, C, T, H, W), dtype=jnp.float32)
    x_multiview = jax.random.normal(k3, (B, C, T, H, W), dtype=jnp.float32)
    image_only_indicator = jnp.array(
        [[0, 1, 2, 2, 0, 1, 2, 0],
         [2, 2, 1, 0, 2, 1, 0, 2]], dtype=jnp.float32)

    out = mv_temporal_blend(x_spatial, x_temporal, x_multiview,
                            image_only_indicator, ALPHA_SPATIAL_MV, GAMMA)
    out = jax.block_until_ready(out)

    ref = reference_blend(x_spatial, x_temporal, x_multiview,
                          image_only_indicator,
                          jnp.float32(ALPHA_SPATIAL_MV), jnp.float32(GAMMA))
    assert out.shape == (B, C, T, H, W)
    assert jnp.allclose(out, ref, atol=1e-5, rtol=1e-5)

    print("KERNEL_OK")
</pallas_src>

<mosaic_0001>
module attributes {stable_mosaic.version = 11 : i64} {
  func.func @_blend_kernel(%arg0: i32, %arg1: i32, %arg2: memref<1x3x2048xf32, #tpu.memory_space<vmem>>, %arg3: memref<1x4x2048xf32, #tpu.memory_space<vmem>>, %arg4: memref<1x4x2048xf32, #tpu.memory_space<vmem>>, %arg5: memref<1x4x2048xf32, #tpu.memory_space<vmem>>, %arg6: memref<1x4x2048xf32, #tpu.memory_space<vmem>>) attributes {dimension_semantics = [#tpu.dimension_semantics<parallel>, #tpu.dimension_semantics<parallel>], iteration_bounds = array<i64: 2, 1>, scalar_prefetch = 0 : i64, scratch_operands = 0 : i64, tpu.core_type = #tpu.core_type<tc>, window_params = [{transform_indices = @transform_0, window_bounds = array<i64: 1, 3, 2048>}, {transform_indices = @transform_1, window_bounds = array<i64: 1, 4, 2048>}, {transform_indices = @transform_2, window_bounds = array<i64: 1, 4, 2048>}, {transform_indices = @transform_3, window_bounds = array<i64: 1, 4, 2048>}, {transform_indices = @transform_4, window_bounds = array<i64: 1, 4, 2048>}]} {
    %c0 = arith.constant 0 : index
    %c0_0 = arith.constant 0 : index
    %c0_1 = arith.constant 0 : index
    %0 = vector.load %arg2[%c0, %c0_0, %c0_1] : memref<1x3x2048xf32, #tpu.memory_space<vmem>>, vector<1x1x2048xf32>
    %c0_2 = arith.constant 0 : index
    %c1 = arith.constant 1 : index
    %c0_3 = arith.constant 0 : index
    %1 = vector.load %arg2[%c0_2, %c1, %c0_3] : memref<1x3x2048xf32, #tpu.memory_space<vmem>>, vector<1x1x2048xf32>
    %c0_4 = arith.constant 0 : index
    %c2 = arith.constant 2 : index
    %c0_5 = arith.constant 0 : index
    %2 = vector.load %arg2[%c0_4, %c2, %c0_5] : memref<1x3x2048xf32, #tpu.memory_space<vmem>>, vector<1x1x2048xf32>
    %c0_6 = arith.constant 0 : index
    %c0_7 = arith.constant 0 : index
    %c0_8 = arith.constant 0 : index
    %3 = vector.load %arg3[%c0_6, %c0_7, %c0_8] : memref<1x4x2048xf32, #tpu.memory_space<vmem>>, vector<1x4x2048xf32>
    %4 = vector.broadcast %0 : vector<1x1x2048xf32> to vector<1x4x2048xf32>
    %5 = arith.mulf %4, %3 : vector<1x4x2048xf32>
    %c0_9 = arith.constant 0 : index
    %c0_10 = arith.constant 0 : index
    %c0_11 = arith.constant 0 : index
    %6 = vector.load %arg5[%c0_9, %c0_10, %c0_11] : memref<1x4x2048xf32, #tpu.memory_space<vmem>>, vector<1x4x2048xf32>
    %7 = vector.broadcast %1 : vector<1x1x2048xf32> to vector<1x4x2048xf32>
    %8 = arith.mulf %7, %6 : vector<1x4x2048xf32>
    %9 = arith.addf %5, %8 : vector<1x4x2048xf32>
    %c0_12 = arith.constant 0 : index
    %c0_13 = arith.constant 0 : index
    %c0_14 = arith.constant 0 : index
    %10 = vector.load %arg4[%c0_12, %c0_13, %c0_14] : memref<1x4x2048xf32, #tpu.memory_space<vmem>>, vector<1x4x2048xf32>
    %11 = vector.broadcast %2 : vector<1x1x2048xf32> to vector<1x4x2048xf32>
    %12 = arith.mulf %11, %10 : vector<1x4x2048xf32>
    %13 = arith.addf %9, %12 : vector<1x4x2048xf32>
    %c0_15 = arith.constant 0 : index
    %c0_16 = arith.constant 0 : index
    %c0_17 = arith.constant 0 : index
    %14 = vector.load %arg6[%c0_15, %c0_16, %c0_17] : memref<1x4x2048xf32, #tpu.memory_space<vmem>>, vector<1x4x2048xf32>
    tpu.vector_store %arg6[%c0_15, %c0_16, %c0_17], %13 {strides = array<i32>} : memref<1x4x2048xf32, #tpu.memory_space<vmem>>, vector<1x4x2048xf32>,
    return
  }
  func.func @transform_0(%arg0: i32, %arg1: i32) -> (i32, i32, i32) {
    %c0_i32 = arith.constant 0 : i32
    %c0_i32_0 = arith.constant 0 : i32
    %c0_i32_1 = arith.constant 0 : i32
    return %arg0, %c0_i32, %c0_i32_0 : i32, i32, i32
  }
  func.func @transform_1(%arg0: i32, %arg1: i32) -> (i32, i32, i32) {
    %c0_i32 = arith.constant 0 : i32
    %c0_i32_0 = arith.constant 0 : i32
    return %arg0, %arg1, %c0_i32 : i32, i32, i32
  }
  func.func @transform_2(%arg0: i32, %arg1: i32) -> (i32, i32, i32) {
    %c0_i32 = arith.constant 0 : i32
    %c0_i32_0 = arith.constant 0 : i32
    return %arg0, %arg1, %c0_i32 : i32, i32, i32
  }
  func.func @transform_3(%arg0: i32, %arg1: i32) -> (i32, i32, i32) {
    %c0_i32 = arith.constant 0 : i32
    %c0_i32_0 = arith.constant 0 : i32
    return %arg0, %arg1, %c0_i32 : i32, i32, i32
  }
  func.func @transform_4(%arg0: i32, %arg1: i32) -> (i32, i32, i32) {
    %c0_i32 = arith.constant 0 : i32
    %c0_i32_0 = arith.constant 0 : i32
    return %arg0, %arg1, %c0_i32 : i32, i32, i32
  }
}

</mosaic_0001>

<bundles_post_ra>
// kernel: tpu_custom_call.1
= control target key start
LH: loop header
LB: loop body
LE: loop exit
PB: predicated region body
PF: predicated region fallthrough
CT: control target
= control target key end

     0   :  { %9 = vsyncpa [#allocation3], 0  ;;  %s1546_s0 = inlined_call_operand.vmem [shape: f32[2,3,2048], index: 0, kind: input, shape index: {}]   ;;  %s1547_s1 = inlined_call_operand.vmem [shape: f32[2,4,2048], index: 1, kind: input, shape index: {}]   ;;  %s1548_s2 = inlined_call_operand.hbm [shape: f32[2,4,2048], index: 2, kind: input, shape index: {}]   ;;  %s1549_s3 = inlined_call_operand.hbm [shape: f32[2,4,2048], index: 3, kind: input, shape index: {}]   ;;  %s1550_s4 = inlined_call_operand.hbm [shape: f32[2,4,2048], index: 4, kind: output, shape index: {}]  }
   0x1   :  { %11 = vsyncpa [#allocation3 + $0x1], 0 }
   0x2   :  { %12 = vsyncpa [#allocation6], 0 }
   0x3   :  { %14 = vsyncpa [#allocation6 + $0x1], 0 }
   0x4   :  { %15 = vsyncpa [#allocation4], 0 }
   0x5   :  { %17 = vsyncpa [#allocation4 + $0x1], 0  ;;  %s1186_s15 = smov 0   ;;  %s1188_s16 = smov 0  }
   0x6   :  { %s1190_s17 = smov 0   ;;  %s1192_s18 = smov 0  }
   0x7   :  { %s1194_s19 = smov 0   ;;  %s1196_s20 = smov 0  }
   0x8 LB: > { %s913_s21 = sadd.s32 4294967295, %s1159_s20   ;;  %s914_s22 = sadd.s32 4294967294, %s1159_s20   ;;  %s1159_s20 = sphi %s1196_s20, %s23_s20   ;;  %s1155_s19 = sphi %s1194_s19, %s1571_s19   ;;  %s1151_s18 = sphi %s1192_s18, %s1570_s18   ;;  %s1147_s17 = sphi %s1190_s17, %s1569_s17   ;;  %s1143_s16 = sphi %s1188_s16, %s1568_s16   ;;  %s1139_s15 = sphi %s1186_s15, %s1567_s15  }
   0x9   : > { %s35_s23 = sadd.s32 1, %s1155_s19  ;;  %s98_s24 = sadd.s32 1, %s1147_s17 }
   0xa   : > { %p37_p0 = scmp.ge.s32.totalorder %s35_s23, 2  ;;  %p105_p1 = scmp.ne.s32.totalorder %s1147_s17, %s1143_s16 }
   0xb   : > { %p106_p2 = scmp.eq.s32.totalorder %s1159_s20, 0  ;;  %p111_p3 = scmp.ne.s32.totalorder %s1143_s16, %s1139_s15 }
   0xc   : > { %s1573_s23 = smov (%p37_p0, %s35_s23), 0  ;;  %p112_p5 = scmp.eq.s32.totalorder %s913_s21, 0 }
   0xd   : > { %1552 = sst [smem:[#allocation11_spill]] %s1573_s23  ;;  %p1227_p4 = por %p106_p2, %p105_p1 }
   0xe   : > { %s93_s26 = ssub.s32 %s1155_s19, %s1573_s23  ;;  %p165_p6 = scmp.eq.s32.totalorder %s913_s21, 1 }
   0xf   : > { %p96_p7 = scmp.eq.s32.totalorder %s93_s26, 0  ;;  %p1233_p8 = por %p112_p5, %p111_p3 }
  0x10   : > { %p1237_p9 = por %p165_p6, %p105_p1  ;;  %p171_p10 = scmp.eq.s32.totalorder %s914_s22, 1 }
  0x11   : > { %s1242_s29 = scalar_select %p96_p7, %s1147_s17, %s98_s24  }
  0x12   : > { %p1244_p11 = por %p171_p10, %p111_p3  ;;  %p916_p12 = scmp.ge.s32.totalorder %s1159_s20, 2 }
  0x13   : > { %p963_p13 = scmp.lt.s32.totalorder %s1159_s20, 2  ;;  %s211_s5 = sand.u32 1, %s1147_s17  }
  0x14   : > { %s917_s6 = sshll.u32 %s211_s5, 6  ;;  %s941_s7 = sshll.u32 %s1155_s19, 6 }
  0x15   : > { %s222_s10 = scalar_lea.hbm %s1548_s2, %s941_s7  ;;  %s215_s11 = scalar_lea.vmem [#allocation2], %s917_s6 }
  0x16   : > { %s226_s12 = sshll.u32 %s215_s11, 4  ;;  %s224_s13 = sshll.u32 %s222_s10, 4  ;;  %s227_s12 = int_to_ptr.vmem [resolvable:$true] %s226_s12  ;;  %s225_s13 = int_to_ptr.hbm [resolvable:$true] %s224_s13 }
  0x17   : > { %p953_p0 = pnand %p963_p13, %p1227_p4  ;;  %p923_p1 = scmp.ge.s32.totalorder %s1159_s20, 1 }
  0x18   : > { %p253_p2 = scmp.lt.s32.totalorder %s1159_s20, 3  ;;  %s212_s14 = scalar_lea.sflag [#allocation3], %s211_s5 }
  0x19   : > { %955 = dma.hbm_to_vmem [thread:$0]  (!%p953_p0), %s225_s13, 1024, %s227_s12, %s212_s14  }
  0x1a   : > { %p254_p3 = pnand %p923_p1, %p253_p2  ;;  %s244_s24 = scalar_lea.hbm %s1549_s3, %s941_s7 }
  0x1b   : > { %s237_s26 = scalar_lea.vmem [#allocation5], %s917_s6  ;;  %s246_s8 = sshll.u32 %s244_s24, 4  ;;  %s247_s8 = int_to_ptr.hbm [resolvable:$true] %s246_s8 }
  0x1c   : > { %s248_s23 = sshll.u32 %s237_s26, 4  ;;  %s234_s9 = scalar_lea.sflag [#allocation6], %s211_s5  ;;  %s249_s23 = int_to_ptr.vmem [resolvable:$true] %s248_s23 }
  0x1d   : > { %958 = dma.hbm_to_vmem [thread:$0]  (!%p953_p0), %s247_s8, 1024, %s249_s23, %s234_s9  }
  0x1e   : > { %257 = sbr.rel (%p254_p3) target bundleno = 112 (0x70), region = 36  ;;  %s1263_s25 = sand.u32 (!%p254_p3), 1, %s1143_s16  }
  0x1f   : > { %s1266_s10 = sshll.u32 (!%p254_p3), %s1263_s25, 6  ;;  %s260_s11 = scalar_lea.sflag (!%p254_p3), [#allocation3], %s1263_s25 }
  0x20   : > { %s1270_s12 = scalar_lea.vmem (!%p254_p3), [#allocation2], %s1266_s10 }
  0x23   : > { %1126 = dma.done.wait (%p1233_p8), %s260_s11, 1024  }
  0x24   : > { %1128 = vsyncadd (%p1233_p8), %s260_s11, 4294966272  ;;  %s270_s23 = scalar_lea.sflag [#allocation6], %s1263_s25  ;;  %s1278_s5 = scalar_lea.vmem [#allocation5], %s1266_s10 }
  0x25   : > { %1130 = dma.done.wait (%p1233_p8), %s270_s23, 1024  }
  0x26   : > { %1132 = vsyncadd (%p1233_p8), %s270_s23, 4294966272  ;;  %p318_p4 = scmp.lt.s32.totalorder %s1151_s18, 1  ;;  %v452_v18 = vld [vmem:[%s1278_s5] sm:$0xff]  ;;  %v453_v19 = vld [vmem:[%s1278_s5 + $0x8] sm:$0xff]  ;;  %vm726_vm0 = vcmask 1043456   ;;  %s1468_s26 = scalar_lea.vmem [#allocation7], %s1266_s10 }
  0x27   : > { %v454_v25 = vld [vmem:[%s1278_s5 + $0x10] sm:$0xff]  ;;  %v455_v31 = vld [vmem:[%s1278_s5 + $0x18] sm:$0xff]  ;;  %v456_v37 = vld [vmem:[%s1278_s5 + $0x20] sm:$0xff]  ;;  %s945_s8 = sshll.u32 %s1151_s18, 6  ;;  %s767_s11 = sshll.u32 %s1468_s26, 4  ;;  %s768_s11 = int_to_ptr.vmem [resolvable:$true] %s767_s11 }
  0x28   : > { %s319_s6 = scalar_select %p318_p4, %s1151_s18, 1  ;;  %v457_v44 = vld [vmem:[%s1278_s5 + $0x28] sm:$0xff]  ;;  %v458_v53 = vld [vmem:[%s1278_s5 + $0x30] sm:$0xff]  ;;  %v459_v60 = vld [vmem:[%s1278_s5 + $0x38] sm:$0xff] }
  0x29   : > { %s765_s10 = scalar_lea.hbm %s1550_s4, %s945_s8  ;;  %s752_s23 = scalar_lea.sflag [#allocation4], %s1263_s25 }
  0x2a   : > { %s943_s7 = sshll.u32 %s319_s6, 6  ;;  %s1093_s14 = scalar_lea.hbm %s1550_s4, 128 }
  0x2b   : > { %s331_s21 = scalar_lea.vmem %s1547_s1, %s943_s7  ;;  %s1292_s24 = scalar_lea.vmem %s1546_s0, %s943_s7 }
  0x2c   : > { %v343_v0 = vld [vmem:[%s331_s21] sm:$0xff]  ;;  %v344_v1 = vld [vmem:[%s331_s21 + $0x8] sm:$0xff]  ;;  %v345_v2 = vld [vmem:[%s331_s21 + $0x10] sm:$0xff] }
  0x2d   : > { %393 = vst [vmem:[#allocation1] ss:$2 sm:$0xff] %v343_v0  ;;  %v346_v3 = vld [vmem:[%s331_s21 + $0x18] sm:$0xff]  ;;  %v347_v4 = vld [vmem:[%s331_s21 + $0x20] sm:$0xff]  ;;  %v348_v5 = vld [vmem:[%s331_s21 + $0x28] sm:$0xff] }
  0x2e   : > { %395 = vst [vmem:[#allocation1 + $0x10] ss:$2 sm:$0xff] %v344_v1  ;;  %v349_v9 = vld [vmem:[%s331_s21 + $0x30] sm:$0xff]  ;;  %v350_v15 = vld [vmem:[%s331_s21 + $0x38] sm:$0xff] }
  0x2f   : > { %397 = vst [vmem:[#allocation1 + $0x20] ss:$2 sm:$0xff] %v345_v2  ;;  %v1301_v10 = vld [vmem:[%s1292_s24] ss:$4 sm:$0xff]  ;;  %v1304_v11 = vld [vmem:[%s1292_s24 + $0x1] ss:$4 sm:$0xff] }
  0x30   : > { %399 = vst [vmem:[#allocation1 + $0x30] ss:$2 sm:$0xff] %v346_v3  ;;  %v353_v20 = vperm.slane %v1301_v10, 0  ;;  %v354_v21 = vperm.slane %v1301_v10, 1  ;;  %v462_v22 = vperm.slane %v1304_v11, 0  ;;  %v463_v26 = vperm.slane %v1304_v11, 1 }
  0x31   : > { %v355_v27 = vperm.slane %v1301_v10, 2  ;;  %v356_v28 = vperm.slane %v1301_v10, 3  ;;  %v464_v33 = vperm.slane %v1304_v11, 2  ;;  %v1338_v34 = vld [vmem:[%s1292_s24 + $0x20] ss:$4 sm:$0xff]  ;;  %v465_v38 = vperm.slane %v1304_v11, 3 }
  0x32   : > { %v1341_v35 = vld [vmem:[%s1292_s24 + $0x21] ss:$4 sm:$0xff]  ;;  %v357_v39 = vperm.slane %v1301_v10, 4  ;;  %v358_v40 = vperm.slane %v1301_v10, 5  ;;  %v466_v42 = vperm.slane %v1304_v11, 4  ;;  %v467_v45 = vperm.slane %v1304_v11, 5 }
  0x33   : > { %v359_v46 = vperm.slane %v1301_v10, 6  ;;  %v360_v47 = vperm.slane %v1301_v10, 7  ;;  %v1359_v48 = vld [vmem:[%s1292_s24 + $0x2] ss:$4 sm:$0xff]  ;;  %v468_v49 = vperm.slane %v1304_v11, 6  ;;  %v469_v50 = vperm.slane %v1304_v11, 7 }
  0x34   : > { %v1294_v6 = vld.sshfl [vmem:[#allocation1] sm:$0xff pattern:$0x75316420]  ;;  %v1296_v7 = vld.sshfl [vmem:[#allocation1 + $0x8] sm:$0xff pattern:$0x75316420] }
  0x35   : > { %408 = vst [vmem:[#allocation1] ss:$2 sm:$0xff] %v347_v4  ;;  %v1298_v8 = vld.sshfl [vmem:[#allocation1 + $0x10] sm:$0xff pattern:$0x75316420]  ;;  %v361_v54 = vperm.slane %v1338_v34, 0 }
  0x36   : > { %v1306_v12 = vld.sshfl [vmem:[#allocation1 + $0x18] sm:$0xff pattern:$0x75316420]  ;;  %v1308_v13 = vld.sshfl [vmem:[#allocation1 + $0x20] sm:$0xff pattern:$0x75316420] }
  0x37   : > { %409 = vst [vmem:[#allocation1 + $0x10] ss:$2 sm:$0xff] %v348_v5  ;;  %v1310_v14 = vld.sshfl [vmem:[#allocation1 + $0x28] sm:$0xff pattern:$0x75316420]  ;;  %v362_v55 = vperm.slane %v1338_v34, 1 }
  0x38   : > { %410 = vst [vmem:[#allocation1 + $0x20] ss:$2 sm:$0xff] %v349_v9  ;;  %v1312_v16 = vld.sshfl [vmem:[#allocation1 + $0x30] sm:$0xff pattern:$0x75316420]  ;;  %v470_v56 = vperm.slane %v1341_v35, 0  ;;  %v441_v57 = vmul.f32 %v1310_v14, %v358_v40 }
  0x39   : > { %v1314_v17 = vld.sshfl [vmem:[#allocation1 + $0x38] sm:$0xff pattern:$0x75316420]  ;;  %v577_v3 = vld [vmem:[%s1270_s12] sm:$0xff]  ;;  %v472_v9 = vperm.slane %v1341_v35, 2  ;;  %v473_v63 = vperm.slane %v1341_v35, 3 }
  0x3a   : > { %411 = vst [vmem:[#allocation1 + $0x30] ss:$2 sm:$0xff] %v350_v15  ;;  %v579_v0 = vld [vmem:[%s1270_s12 + $0x10] sm:$0xff]  ;;  %v437_v15 = vmul.f32 %v1296_v7, %v354_v21  ;;  %v365_v62 = vperm.slane %v1338_v34, 4  ;;  %v366_v7 = vperm.slane %v1338_v34, 5  ;;  %v443_v10 = vmul.f32 %v1314_v17, %v360_v47 }
  0x3c   : > { %v1321_v23 = vld.sshfl [vmem:[#allocation1] sm:$0xff pattern:$0x75316420]  ;;  %v1323_v24 = vld.sshfl [vmem:[#allocation1 + $0x8] sm:$0xff pattern:$0x75316420] }
  0x3d   : > { %502 = vst [vmem:[#allocation1] ss:$2 sm:$0xff] %v452_v18  ;;  %v445_v17 = vmul.f32 %v1323_v24, %v362_v55 }
  0x3e   : > { %v1329_v29 = vld.sshfl [vmem:[#allocation1 + $0x10] sm:$0xff pattern:$0x75316420]  ;;  %v1331_v30 = vld.sshfl [vmem:[#allocation1 + $0x18] sm:$0xff pattern:$0x75316420] }
  0x3f   : > { %504 = vst [vmem:[#allocation1 + $0x10] ss:$2 sm:$0xff] %v453_v19  ;;  %v1334_v32 = vld.sshfl [vmem:[#allocation1 + $0x20] sm:$0xff pattern:$0x75316420] }
  0x40   : > { %v1343_v36 = vld.sshfl [vmem:[#allocation1 + $0x28] sm:$0xff pattern:$0x75316420] }
  0x41   : > { %506 = vst [vmem:[#allocation1 + $0x20] ss:$2 sm:$0xff] %v454_v25  ;;  %v1349_v41 = vld.sshfl [vmem:[#allocation1 + $0x30] sm:$0xff pattern:$0x75316420] }
  0x42   : > { %v1352_v43 = vld.sshfl [vmem:[#allocation1 + $0x38] sm:$0xff pattern:$0x75316420]  ;;  %v578_v25 = vld [vmem:[%s1270_s12 + $0x8] sm:$0xff] }
  0x43   : > { %508 = vst [vmem:[#allocation1 + $0x30] ss:$2 sm:$0xff] %v455_v31  ;;  %v436_v31 = vmul.f32 %v1294_v6, %v353_v20  ;;  %v439_v6 = vmul.f32 %v1306_v12, %v356_v28  ;;  %v440_v20 = vmul.f32 %v1308_v13, %v357_v39  ;;  %v444_v12 = vmul.f32 %v1321_v23, %v361_v54  ;;  %v580_v13 = vld [vmem:[%s1270_s12 + $0x18] sm:$0xff] }
  0x44   : > { %v509_v51 = vld.sshfl [vmem:[#allocation1] sm:$0xff pattern:$0x75316420]  ;;  %v510_v52 = vld.sshfl [vmem:[#allocation1 + $0x8] sm:$0xff pattern:$0x75316420]  ;;  %v1437_v54 = vmul.f32 %v1343_v36, %v366_v7 }
  0x45   : > { %517 = vst [vmem:[#allocation1] ss:$2 sm:$0xff] %v456_v37  ;;  %v1383_v37 = vld [vmem:[%s1292_s24 + $0x22] ss:$4 sm:$0xff]  ;;  %v546_v28 = vmul.f32 %v510_v52, %v463_v26  ;;  %v1557_v36 = vperm.slane %v1341_v35, 1 }
  0x46   : > { %v511_v58 = vld.sshfl [vmem:[#allocation1 + $0x10] sm:$0xff pattern:$0x75316420]  ;;  %v512_v59 = vld.sshfl [vmem:[#allocation1 + $0x18] sm:$0xff pattern:$0x75316420] }
  0x47   : > { %518 = vst [vmem:[#allocation1 + $0x10] ss:$2 sm:$0xff] %v457_v44  ;;  %v363_v44 = vperm.slane %v1338_v34, 2  ;;  %v595_v39 = vperm.slane %v1383_v37, 0  ;;  %v581_v26 = vld [vmem:[%s1270_s12 + $0x20] sm:$0xff]  ;;  %v598_v52 = vperm.slane %v1383_v37, 3 }
  0x48   : > { %v513_v1 = vld.sshfl [vmem:[#allocation1 + $0x20] sm:$0xff pattern:$0x75316420]  ;;  %v514_v2 = vld.sshfl [vmem:[#allocation1 + $0x28] sm:$0xff pattern:$0x75316420] }
  0x49   : > { %519 = vst [vmem:[#allocation1 + $0x20] ss:$2 sm:$0xff] %v458_v53  ;;  %v364_v53 = vperm.slane %v1338_v34, 3  ;;  %v446_v23 = vmul.f32 %v1329_v29, %v363_v44  ;;  %v549_v47 = vmul.f32 %v513_v1, %v466_v42  ;;  %v550_v29 = vmul.f32 %v514_v2, %v467_v45  ;;  %v582_v42 = vld [vmem:[%s1270_s12 + $0x28] sm:$0xff]  ;;  %v583_v2 = vld [vmem:[%s1270_s12 + $0x30] sm:$0xff] }
  0x4a   : > { %v515_v18 = vld.sshfl [vmem:[#allocation1 + $0x30] sm:$0xff pattern:$0x75316420]  ;;  %v516_v19 = vld.sshfl [vmem:[#allocation1 + $0x38] sm:$0xff pattern:$0x75316420] }
  0x4b   : > { %520 = vst [vmem:[#allocation1 + $0x30] ss:$2 sm:$0xff] %v459_v60  ;;  %v438_v60 = vmul.f32 %v1298_v8, %v355_v27  ;;  %v442_v8 = vmul.f32 %v1312_v16, %v359_v46  ;;  %v545_v27 = vmul.f32 %v509_v51, %v462_v22  ;;  %v547_v16 = vmul.f32 %v511_v58, %v464_v33 }
  0x4c   : > { %v521_v4 = vld.sshfl [vmem:[#allocation1] sm:$0xff pattern:$0x75316420]  ;;  %v522_v5 = vld.sshfl [vmem:[#allocation1 + $0x8] sm:$0xff pattern:$0x75316420]  ;;  %v447_v22 = vmul.f32 %v1331_v30, %v364_v53  ;;  %v548_v46 = vmul.f32 %v512_v59, %v465_v38  ;;  %v551_v30 = vmul.f32 %v515_v18, %v468_v49  ;;  %v448_v38 = vmul.f32 %v1334_v32, %v365_v62 }
  0x4d   : > { %627 = vst [vmem:[#allocation1] ss:$2 sm:$0xff] %v577_v3  ;;  %v596_v3 = vperm.slane %v1383_v37, 1  ;;  %v597_v51 = vperm.slane %v1383_v37, 2  ;;  %v561_v55 = vadd.f32 %v545_v27, %v436_v31  ;;  %v562_v58 = vadd.f32 %v546_v28, %v437_v15 }
  0x4e   : > { %v523_v21 = vld.sshfl [vmem:[#allocation1 + $0x10] sm:$0xff pattern:$0x75316420]  ;;  %v524_v61 = vld.sshfl [vmem:[#allocation1 + $0x18] sm:$0xff pattern:$0x75316420]  ;;  %v563_v45 = vadd.f32 %v547_v16, %v438_v60  ;;  %v552_v49 = vmul.f32 %v516_v19, %v469_v50  ;;  %v553_v32 = vmul.f32 %v521_v4, %v470_v56  ;;  %v554_v62 = vmul.f32 %v522_v5, %v1557_v36 }
  0x4f   : > { %629 = vst [vmem:[#allocation1 + $0x10] ss:$2 sm:$0xff] %v578_v25  ;;  %v474_v59 = vperm.slane %v1341_v35, 4  ;;  %v1558_v15 = vperm.slane %v1359_v48, 0  ;;  %v1559_v31 = vperm.slane %v1359_v48, 1  ;;  %v564_v53 = vadd.f32 %v548_v46, %v439_v6  ;;  %v584_v56 = vld [vmem:[%s1270_s12 + $0x38] sm:$0xff] }
  0x50   : > { %v525_v14 = vld.sshfl [vmem:[#allocation1 + $0x20] sm:$0xff pattern:$0x75316420]  ;;  %v1413_v40 = vld.sshfl [vmem:[#allocation1 + $0x28] sm:$0xff pattern:$0x75316420]  ;;  %v565_v60 = vadd.f32 %v549_v47, %v440_v20  ;;  %v566_v50 = vadd.f32 %v550_v29, %v441_v57  ;;  %v567_v19 = vadd.f32 %v551_v30, %v442_v8  ;;  %v556_v27 = vmul.f32 %v524_v61, %v473_v63 }
  0x51   : > { %631 = vst [vmem:[#allocation1 + $0x20] ss:$2 sm:$0xff] %v579_v0  ;;  %v475_v0 = vperm.slane %v1341_v35, 5  ;;  %v1560_v5 = vperm.slane %v1359_v48, 2  ;;  %v1561_v16 = vperm.slane %v1359_v48, 3  ;;  %v568_v20 = vadd.f32 %v552_v49, %v443_v10  ;;  %s769_s12 = sshll.u32 %s765_s10, 4  ;;  %s770_s12 = int_to_ptr.hbm [resolvable:$true] %s769_s12 }
  0x52   : > { %v1427_v33 = vld.sshfl [vmem:[#allocation1 + $0x30] sm:$0xff pattern:$0x75316420]  ;;  %v1429_v24 = vld.sshfl [vmem:[#allocation1 + $0x38] sm:$0xff pattern:$0x75316420]  ;;  %v569_v46 = vadd.f32 %v553_v32, %v444_v12  ;;  %v570_v47 = vadd.f32 %v554_v62, %v445_v17  ;;  %v557_v57 = vmul.f32 %v525_v14, %v474_v59  ;;  %v572_v10 = vadd.f32 %v556_v27, %v447_v22 }
  0x53   : > { %633 = vst [vmem:[#allocation1 + $0x30] ss:$2 sm:$0xff] %v580_v13  ;;  %v555_v13 = vmul.f32 %v523_v21, %v472_v9  ;;  %v600_v21 = vperm.slane %v1383_v37, 5  ;;  %v1562_v30 = vperm.slane %v1359_v48, 4  ;;  %v1565_v32 = vperm.slane %v1359_v48, 7  ;;  %s1087_s5 = sshra.s32 %s770_s12, 4  ;;  %s1088_s5 = int_to_ptr.hbm [resolvable:$true] %s1087_s5 }
  0x54   : > { %v634_v1 = vld.sshfl [vmem:[#allocation1] sm:$0xff pattern:$0x75316420]  ;;  %v635_v25 = vld.sshfl [vmem:[#allocation1 + $0x8] sm:$0xff pattern:$0x75316420]  ;;  %v558_v22 = vmul.f32 %v1413_v40, %v475_v0  ;;  %p1094_p8 = scmp.lt.s32.totalorder %s1088_s5, %s1550_s4 }
  0x55   : > { %642 = vst [vmem:[#allocation1] ss:$2 sm:$0xff] %v581_v26  ;;  %v670_v18 = vmul.f32 %v634_v1, %v1558_v15  ;;  %v671_v44 = vmul.f32 %v635_v25, %v1559_v31  ;;  %v599_v1 = vperm.slane %v1383_v37, 4  ;;  %v571_v15 = vadd.f32 %v555_v13, %v446_v23  ;;  %s1089_s6 = scalar_lea.hbm %s1088_s5, 64 }
  0x56   : > { %v636_v7 = vld.sshfl [vmem:[#allocation1 + $0x10] sm:$0xff pattern:$0x75316420]  ;;  %v637_v11 = vld.sshfl [vmem:[#allocation1 + $0x18] sm:$0xff pattern:$0x75316420]  ;;  %p1090_p5 = scmp.ne.s32.totalorder %s1088_s5, %s1089_s6  ;;  %p1095_p10 = scmp.lt.s32.totalorder %s1093_s14, %s1089_s6 }
  0x57   : > { %643 = vst [vmem:[#allocation1 + $0x10] ss:$2 sm:$0xff] %v582_v42  ;;  %v687_v4 = vadd.f32 %v671_v44, %v562_v58  ;;  %v672_v28 = vmul.f32 %v636_v7, %v1560_v5  ;;  %v673_v26 = vmul.f32 %v637_v11, %v1561_v16  ;;  %v686_v61 = vadd.f32 %v670_v18, %v561_v55 }
  0x58   : > { %v638_v25 = vld.sshfl [vmem:[#allocation1 + $0x20] sm:$0xff pattern:$0x75316420]  ;;  %v639_v6 = vld.sshfl [vmem:[#allocation1 + $0x28] sm:$0xff pattern:$0x75316420]  ;;  %v573_v18 = vadd.f32 %v557_v57, %v448_v38  ;;  %p1091_p6 = pnand %p1090_p5, %p1237_p9  ;;  %p1096_p13 = por %p1095_p10, %p1094_p8 }
  0x59   : > { %644 = vst [vmem:[#allocation1 + $0x20] ss:$2 sm:$0xff] %v583_v2  ;;  %v718_v63 = vrot.slane %v687_v4, 4  ;;  %v689_v9 = vadd.f32 %v673_v26, %v564_v53  ;;  %v674_v42 = vmul.f32 %v638_v25, %v1562_v30  ;;  %v1563_v58 = vperm.slane %v1359_v48, 5 }
  0x5a   : > { %v640_v8 = vld.sshfl [vmem:[#allocation1 + $0x30] sm:$0xff pattern:$0x75316420]  ;;  %v641_v29 = vld.sshfl [vmem:[#allocation1 + $0x38] sm:$0xff pattern:$0x75316420]  ;;  %v688_v14 = vadd.f32 %v672_v28, %v563_v45  ;;  %p1092_p7 = pneg %p1091_p6 }
  0x5b   : > { %v675_v36 = vmul.f32 %v639_v6, %v1563_v58  ;;  %645 = vst [vmem:[#allocation1 + $0x30] ss:$2 sm:$0xff] %v584_v56  ;;  %v727_v12 = vsel %vm726_vm0, %v686_v61, %v718_v63  ;;  %v719_v17 = vrot.slane %v689_v9, 4  ;;  %v1564_v55 = vperm.slane %v1359_v48, 6 }
  0x5c   : > { %743 = vst [vmem:[%s1468_s26] sm:$0xff] %v727_v12  ;;  %v677_v62 = vmul.f32 %v641_v29, %v1565_v32  ;;  %v646_v2 = vld.sshfl [vmem:[#allocation1] sm:$0xff pattern:$0x75316420]  ;;  %v647_v23 = vld.sshfl [vmem:[#allocation1 + $0x8] sm:$0xff pattern:$0x75316420]  ;;  %v690_v7 = vadd.f32 %v674_v42, %v565_v60  ;;  %v574_v6 = vadd.f32 %v558_v22, %v1437_v54  ;;  %p1097_p0 = pnand %p1096_p13, %p1092_p7 }
  0x5d   : > { %v676_v59 = vmul.f32 %v640_v8, %v1564_v55  ;;  %v691_v49 = vadd.f32 %v675_v36, %v566_v50  ;;  %v728_v45 = vsel %vm726_vm0, %v688_v14, %v719_v17  ;;  %v678_v31 = vmul.f32 %v646_v2, %v595_v39 }
  0x5e   : > { %v679_v44 = vmul.f32 %v647_v23, %v596_v3  ;;  %v367_v53 = vperm.slane %v1338_v34, 6  ;;  %744 = vst [vmem:[%s1468_s26 + $0x8] sm:$0xff] %v728_v45  ;;  %v693_v11 = vadd.f32 %v677_v62, %v568_v20  ;;  %v648_v50 = vld.sshfl [vmem:[#allocation1 + $0x10] sm:$0xff pattern:$0x75316420]  ;;  %v368_v13 = vperm.slane %v1338_v34, 7 }
  0x5f   : > { %v720_v48 = vrot.slane %v691_v49, 4  ;;  %v692_v40 = vadd.f32 %v676_v59, %v567_v19  ;;  %v649_v0 = vld.sshfl [vmem:[#allocation1 + $0x18] sm:$0xff pattern:$0x75316420]  ;;  %v476_v27 = vperm.slane %v1341_v35, 6  ;;  %v477_v39 = vperm.slane %v1341_v35, 7 }
  0x60   : > { %v695_v38 = vadd.f32 %v679_v44, %v570_v47  ;;  %v721_v3 = vrot.slane %v693_v11, 4  ;;  %v680_v60 = vmul.f32 %v648_v50, %v597_v51  ;;  %v681_v4 = vmul.f32 %v649_v0, %v598_v52  ;;  %v650_v5 = vld.sshfl [vmem:[#allocation1 + $0x20] sm:$0xff pattern:$0x75316420] }
  0x61   : > { %v729_v56 = vsel %vm726_vm0, %v690_v7, %v720_v48  ;;  %v694_v34 = vadd.f32 %v678_v31, %v569_v46  ;;  %v651_v28 = vld.sshfl [vmem:[#allocation1 + $0x28] sm:$0xff pattern:$0x75316420]  ;;  %v682_v16 = vmul.f32 %v650_v5, %v599_v1  ;;  %v560_v35 = vmul.f32 %v1429_v24, %v477_v39 }
  0x62   : > { %745 = vst [vmem:[%s1468_s26 + $0x10] sm:$0xff] %v729_v56  ;;  %v722_v19 = vrot.slane %v695_v38, 4  ;;  %v730_v26 = vsel %vm726_vm0, %v692_v40, %v721_v3  ;;  %v697_v25 = vadd.f32 %v681_v4, %v572_v10  ;;  %v683_v20 = vmul.f32 %v651_v28, %v600_v21  ;;  %v652_v47 = vld.sshfl [vmem:[#allocation1 + $0x30] sm:$0xff pattern:$0x75316420] }
  0x63   : > { %746 = vst [vmem:[%s1468_s26 + $0x18] sm:$0xff] %v730_v26  ;;  %v451_v52 = vmul.f32 %v1352_v43, %v368_v13  ;;  %v559_v46 = vmul.f32 %v1427_v33, %v476_v27  ;;  %v601_v1 = vperm.slane %v1383_v37, 6  ;;  %v653_v57 = vld.sshfl [vmem:[#allocation1 + $0x38] sm:$0xff pattern:$0x75316420]  ;;  %v696_v24 = vadd.f32 %v680_v60, %v571_v15 }
  0x64   : > { %v731_v51 = vsel %vm726_vm0, %v694_v34, %v722_v19  ;;  %v723_v61 = vrot.slane %v697_v25, 4  ;;  %v699_v63 = vadd.f32 %v683_v20, %v574_v6  ;;  %v602_v54 = vperm.slane %v1383_v37, 7 }
  0x65   : > { %747 = vst [vmem:[%s1468_s26 + $0x20] sm:$0xff] %v731_v51  ;;  %v698_v9 = vadd.f32 %v682_v16, %v573_v18  ;;  %v450_v21 = vmul.f32 %v1349_v41, %v367_v53  ;;  %v576_v8 = vadd.f32 %v560_v35, %v451_v52  ;;  %v684_v29 = vmul.f32 %v652_v47, %v601_v1 }
  0x66   : > { %v732_v43 = vsel %vm726_vm0, %v696_v24, %v723_v61  ;;  %v724_v33 = vrot.slane %v699_v63, 4  ;;  %v685_v30 = vmul.f32 %v653_v57, %v602_v54 }
  0x67   : > { %748 = vst [vmem:[%s1468_s26 + $0x28] sm:$0xff] %v732_v43  ;;  %v575_v58 = vadd.f32 %v559_v46, %v450_v21 }
  0x68   : > { %v733_v42 = vsel %vm726_vm0, %v698_v9, %v724_v33  ;;  %v701_v37 = vadd.f32 %v685_v30, %v576_v8 }
  0x69   : > { %749 = vst [vmem:[%s1468_s26 + $0x30] sm:$0xff] %v733_v42  ;;  %v700_v41 = vadd.f32 %v684_v29, %v575_v58 }
  0x6a   : > { %v725_v36 = vrot.slane %v701_v37, 4 }
  0x6c   : > { %v734_v15 = vsel %vm726_vm0, %v700_v41, %v725_v36 }
  0x6d   : > { %750 = vst [vmem:[%s1468_s26 + $0x38] sm:$0xff] %v734_v15 }
  0x6e   : > { %1100 = shalt.err (!%p1097_p0)
}
  0x6f   : > { %950 = dma.vmem_to_hbm [thread:$0]  (%p1237_p9), %s768_s11, 1024, %s770_s12, %s752_s23  }
  0x70 PF: > { %s781_s25 = sand.u32 1, %s1139_s15   ;;  %p960_p1 = pnand %p916_p12, %p1244_p11 }
  0x71   : > { %s782_s22 = scalar_lea.sflag [#allocation4], %s781_s25 }
  0x72   : > { %p961_p2 = pneg %p960_p1 }
  0x74   : > { %1134 = dma.done.wait (%p961_p2), %s782_s22, 1024  }
  0x75   : > { %1136 = vsyncadd (%p961_p2), %s782_s22, 4294966272  ;;  %s23_s20 = sadd.s32 1, %s1159_s20   ;;  %s1566_s28 = sld [smem:[#allocation11_spill]] }
  0x76   : > { %p20_p3 = scmp.ge.s32.totalorder %s23_s20, 4   ;;  %s1567_s15 = smov %s1143_s16 }
  0x77   : > { %s1568_s16 = smov %s1147_s17  ;;  %s1569_s17 = smov %s1242_s29 }
  0x78   : > { %s1570_s18 = smov %s1155_s19  ;;  %22 = sbr.rel (!%p20_p3) target bundleno = 8 (0x8), region = 114 }
  0x7b   : > { %s1571_s19 = smov %s1566_s28 }
  0x7d   :  { %788 = vsyncpa [#allocation3], 1 }
  0x7e   :  { %790 = vsyncpa [#allocation3 + $0x1], 1 }
  0x7f   :  { %791 = vsyncpa [#allocation6], 1 }
  0x80   :  { %793 = vsyncpa [#allocation6 + $0x1], 1 }
  0x81   :  { %794 = vsyncpa [#allocation4], 1 }
  0x82   :  { %796 = vsyncpa [#allocation4 + $0x1], 1 }

</bundles_post_ra>
